<compile_context>
chip_gen: v7x
topology: tpu7x:2x2x1
jax: 0.10.0
libtpu: 0.0.40
codegen_flags: <defaults>
</compile_context>

<pallas_src>
import jax
import jax.numpy as jnp
from jax.experimental import pallas as pl
from jax.experimental.pallas import tpu as pltpu


def _rmsnorm_kernel(x_ref, g_ref, o_ref):
    # x_ref: (1, C, T_HW) tile; g_ref: (1, C, 1) already scaled by sqrt(C).
    xf = x_ref[...].astype(jnp.float32)
    sumsq = jnp.sum(xf * xf, axis=1, keepdims=True)          # (1, 1, T_HW)
    inv = jax.lax.rsqrt(jnp.maximum(sumsq, 1e-24))           # EUP rsqrt
    o_ref[...] = (xf * inv * g_ref[...].astype(jnp.float32)).astype(o_ref.dtype)


def _round_up(x, m):
    return ((x + m - 1) // m) * m


def _tpu_vmem_capacity_bytes():
    try:
        return int(pltpu.get_tpu_info().vmem_capacity_bytes)
    except Exception:
        return 128 * 1024 * 1024  # assume v5e/v6e-class if query unavailable


def _pick_hw_tile(B, C, HW, in_itemsize, budget_bytes, max_tile):
    """Largest lane-dense HW tile under the per-step VMEM budget."""
    if HW <= 128:
        return HW  # single block equal to the full (tiny) extent

    # Per-column VMEM footprint: double-buffered input + output tiles plus one
    # f32 working copy for the reduction.
    per_col = C * (4 * in_itemsize + 4)
    t = max(128, (budget_bytes // per_col) // 128 * 128)
    t = min(t, max_tile, _round_up(HW, 128))

    # Keep >= ~4 total grid steps so v7x's 2 TensorCores both get work.
    n_target = max(1, -(-4 // B))
    if HW >= n_target * 128:
        t = min(t, max(128, (HW // n_target) // 128 * 128))

    # Prefer a multiple-of-128 divisor of HW (all blocks full -> unmasked vst),
    # but only if it doesn't shrink the tile by more than 2x; otherwise rely on
    # Pallas masking of the ragged last block.
    if HW % t != 0 and HW % 128 == 0:
        m, limit = HW // 128, t // 128
        for d in range(limit, 0, -1):
            if m % d == 0:
                if d * 128 * 2 >= t:
                    t = d * 128
                break
    return int(t)


def rmsnorm(x, g):
    """x: (B, C, H, W) NCHW;  g: (1, C, 1, 1).  Returns (B, C, H, W)."""
    B, C, H, W = x.shape
    HW = H * W
    in_bytes = jnp.dtype(x.dtype).itemsize

    vmem_cap = _tpu_vmem_capacity_bytes()
    if vmem_cap <= 64 * 1024 * 1024:
        # v7x-class: 64 MiB physical VMEM per TC, very fast HBM -> big tiles,
        # but cap the scoped limit well below physical.
        budget_bytes, max_tile = 20 * 1024 * 1024, 16384
        vmem_limit = 48 * 1024 * 1024
    else:
        # v5e / v6e: 128 MiB physical VMEM.
        budget_bytes, max_tile = 40 * 1024 * 1024, 8192
        vmem_limit = 96 * 1024 * 1024

    t_hw = _pick_hw_tile(B, C, HW, in_bytes, budget_bytes, max_tile)
    n_hw = pl.cdiv(HW, t_hw)

    x_flat = x.reshape(B, C, HW)                       # free (contiguous) reshape
    # Fold sqrt(C) into the tiny gamma once in the wrapper.
    g_flat = g.reshape(1, C, 1).astype(jnp.float32) * (C ** 0.5)

    cost = pl.CostEstimate(
        flops=3 * B * C * HW,
        transcendentals=B * HW,
        bytes_accessed=2 * B * C * HW * in_bytes + C * 4,
    )

    out_flat = pl.pallas_call(
        _rmsnorm_kernel,
        out_shape=jax.ShapeDtypeStruct((B, C, HW), x.dtype),
        grid_spec=pltpu.PrefetchScalarGridSpec(
            num_scalar_prefetch=0,
            grid=(B, n_hw),
            in_specs=[
                pl.BlockSpec((1, C, t_hw), lambda b, h: (b, 0, h)),
                pl.BlockSpec((1, C, 1), lambda b, h: (0, 0, 0)),
            ],
            out_specs=pl.BlockSpec((1, C, t_hw), lambda b, h: (b, 0, h)),
        ),
        compiler_params=pltpu.CompilerParams(
            dimension_semantics=("parallel", "parallel"),
            vmem_limit_bytes=vmem_limit,
        ),
        cost_estimate=cost,
    )(x_flat, g_flat)

    return out_flat.reshape(B, C, H, W)


def rmsnorm_ref(x, g):
    # Pure-JAX reference matching the PyTorch forward.
    C = x.shape[1]
    norm = jnp.sqrt(jnp.sum(x.astype(jnp.float32) ** 2, axis=1, keepdims=True))
    normed = x.astype(jnp.float32) / jnp.maximum(norm, 1e-12)
    return (normed * g * (C ** 0.5)).astype(x.dtype)


if __name__ == "__main__":
    key = jax.random.PRNGKey(0)
    B, C, H, W = 2, 4, 16, 16
    x = jax.random.normal(key, (B, C, H, W), dtype=jnp.float32)
    # Deterministic parameter init: module initializes g to ones(1, dim, 1, 1).
    g = jnp.ones((1, C, 1, 1), dtype=jnp.float32)

    out = rmsnorm(x, g)
    jax.block_until_ready(out)

    ref = rmsnorm_ref(x, g)
    assert out.shape == (B, C, H, W)
    assert jnp.allclose(out, ref, atol=1e-5, rtol=1e-5), "mismatch vs reference"
    print("KERNEL_OK")
</pallas_src>

<mosaic_0001>
module attributes {stable_mosaic.version = 11 : i64} {
  func.func @_rmsnorm_kernel(%arg0: i32, %arg1: i32, %arg2: memref<1x4x128xf32, #tpu.memory_space<vmem>>, %arg3: memref<1x4x1xf32, #tpu.memory_space<vmem>>, %arg4: memref<1x4x128xf32, #tpu.memory_space<vmem>>) attributes {dimension_semantics = [#tpu.dimension_semantics<parallel>, #tpu.dimension_semantics<parallel>], iteration_bounds = array<i64: 2, 2>, scalar_prefetch = 0 : i64, scratch_operands = 0 : i64, tpu.core_type = #tpu.core_type<tc>, window_params = [{transform_indices = @transform_0, window_bounds = array<i64: 1, 4, 128>}, {pipeline_mode = #tpu.pipeline_mode<synchronous>, transform_indices = @transform_1, window_bounds = array<i64: 1, 4, 1>}, {transform_indices = @transform_2, window_bounds = array<i64: 1, 4, 128>}]} {
    %c0 = arith.constant 0 : index
    %c0_0 = arith.constant 0 : index
    %c0_1 = arith.constant 0 : index
    %0 = vector.load %arg2[%c0, %c0_0, %c0_1] : memref<1x4x128xf32, #tpu.memory_space<vmem>>, vector<1x4x128xf32>
    %1 = arith.mulf %0, %0 : vector<1x4x128xf32>
    %cst = arith.constant dense<0.000000e+00> : vector<1x128xf32>
    %2 = vector.multi_reduction <add>, %1, %cst [1] : vector<1x4x128xf32> to vector<1x128xf32>
    %3 = vector.shape_cast %2 : vector<1x128xf32> to vector<1x1x128xf32>
    %cst_2 = arith.constant 1.000000e-24 : f32
    %4 = vector.broadcast %cst_2 : f32 to vector<1x1x128xf32>
    %5 = arith.maximumf %3, %4 : vector<1x1x128xf32>
    %6 = math.rsqrt %5 : vector<1x1x128xf32>
    %7 = vector.broadcast %6 : vector<1x1x128xf32> to vector<1x4x128xf32>
    %8 = arith.mulf %0, %7 : vector<1x4x128xf32>
    %c0_3 = arith.constant 0 : index
    %c0_4 = arith.constant 0 : index
    %c0_5 = arith.constant 0 : index
    %9 = vector.load %arg3[%c0_3, %c0_4, %c0_5] : memref<1x4x1xf32, #tpu.memory_space<vmem>>, vector<1x4x1xf32>
    %10 = vector.broadcast %9 : vector<1x4x1xf32> to vector<1x4x128xf32>
    %11 = arith.mulf %8, %10 : vector<1x4x128xf32>
    %c0_6 = arith.constant 0 : index
    %c0_7 = arith.constant 0 : index
    %c0_8 = arith.constant 0 : index
    %12 = vector.load %arg4[%c0_6, %c0_7, %c0_8] : memref<1x4x128xf32, #tpu.memory_space<vmem>>, vector<1x4x128xf32>
    tpu.vector_store %arg4[%c0_6, %c0_7, %c0_8], %11 {strides = array<i32>} : memref<1x4x128xf32, #tpu.memory_space<vmem>>, vector<1x4x128xf32>,
    return
  }
  func.func @transform_0(%arg0: i32, %arg1: i32) -> (i32, i32, i32) {
    %c0_i32 = arith.constant 0 : i32
    %c0_i32_0 = arith.constant 0 : i32
    return %arg0, %c0_i32, %arg1 : i32, i32, i32
  }
  func.func @transform_1(%arg0: i32, %arg1: i32) -> (i32, i32, i32) {
    %c0_i32 = arith.constant 0 : i32
    %c0_i32_0 = arith.constant 0 : i32
    %c0_i32_1 = arith.constant 0 : i32
    %c0_i32_2 = arith.constant 0 : i32
    return %c0_i32, %c0_i32_0, %c0_i32_1 : i32, i32, i32
  }
  func.func @transform_2(%arg0: i32, %arg1: i32) -> (i32, i32, i32) {
    %c0_i32 = arith.constant 0 : i32
    %c0_i32_0 = arith.constant 0 : i32
    return %arg0, %c0_i32, %arg1 : i32, i32, i32
  }
}

</mosaic_0001>

<bundles_post_ra>
// kernel: tpu_custom_call.1
= control target key start
LH: loop header
LB: loop body
LE: loop exit
PB: predicated region body
PF: predicated region fallthrough
CT: control target
= control target key end

     0   :  { %s851_s0 = inlined_call_operand.hbm [shape: f32[2,4,256], index: 0, kind: input, shape index: {}]   ;;  %s852_s1 = inlined_call_operand.hbm [shape: f32[1,4,1], index: 1, kind: input, shape index: {}]   ;;  %s853_s2 = inlined_call_operand.hbm [shape: f32[2,4,256], index: 2, kind: output, shape index: {}]  }
   0x1   :  { %860 = sst [smem:[#allocation13_spill]] %s852_s1 }
   0x2   :  { %7 = vsyncpa [#allocation3], 0 }
   0x3   :  { %9 = vsyncpa [#allocation3 + $0x1], 0 }
   0x4   :  { %10 = vsyncpa [#allocation6], 0 }
   0x5   :  { %11 = vsyncpa [#allocation4], 0 }
   0x6   :  { %13 = vsyncpa [#allocation4 + $0x1], 0  ;;  %s613_s9 = smov 0   ;;  %s615_s10 = smov 0  }
   0x7   :  { %s617_s11 = smov 0   ;;  %s619_s12 = smov 0  }
   0x8   :  { %s621_s13 = smov 0   ;;  %s623_s14 = smov 0  }
   0x9   :  { %s625_s15 = smov 0   ;;  %s627_s16 = smov 0  }
   0xa LB: > { %s322_s17 = sadd.s32 4294967295, %s592_s16   ;;  %s323_s18 = sadd.s32 4294967294, %s592_s16   ;;  %s592_s16 = sphi %s627_s16, %s19_s16   ;;  %s588_s15 = sphi %s625_s15, %s886_s15   ;;  %s584_s14 = sphi %s623_s14, %s885_s14   ;;  %s580_s13 = sphi %s621_s13, %s884_s13   ;;  %s576_s12 = sphi %s619_s12, %s883_s12   ;;  %s572_s11 = sphi %s617_s11, %s882_s11   ;;  %s568_s10 = sphi %s615_s10, %s881_s10   ;;  %s564_s9 = sphi %s613_s9, %s880_s9  }
   0xb   : > { %p53_p0 = scmp.ne.s32.totalorder %s568_s10, %s564_s9  ;;  %p657_p1 = scmp.eq.s32.totalorder %s322_s17, 0 }
   0xc   : > { %p661_p2 = scmp.eq.s32.totalorder %s322_s17, 3  ;;  %p106_p3 = scmp.eq.s32.totalorder %s323_s18, 3 }
   0xd   : > { %s861_s19 = scalar_select %p657_p1, 1, 0 }
   0xe   : > { %s862_s20 = scalar_select %p661_p2, 1, 0 }
   0xf   : > { %p667_p4 = por %p657_p1, %p53_p0  ;;  %p324_p5 = scmp.ge.s32.totalorder %s592_s16, 1 }
  0x10   : > { %p672_p6 = por %p106_p3, %p53_p0  ;;  %p113_p7 = scmp.lt.s32.totalorder %s592_s16, 5 }
  0x11   : > { %s863_s21 = scalar_select %p667_p4, 1, 0 }
  0x12   : > { %s864_s22 = scalar_select %p672_p6, 1, 0 }
  0x13   : > { %p677_p8 = pnand %p324_p5, %p113_p7  ;;  %s594_s24 = smov [#allocation5]  }
  0x14   : > { %865 = sst [smem:[#allocation11_spill]] %s864_s22  ;;  %s126_s25 = sshll.u32 %s594_s24, 4  ;;  %s127_s25 = int_to_ptr.vmem [resolvable:$true] %s126_s25 }
  0x15   : > { %s866_s23 = scalar_select %p677_p8, 1, 0 }
  0x16   : > { %p347_p9 = pneg %p677_p8  ;;  %s28_s27 = sadd.s32 1, %s584_s14 }
  0x17   : > { %s868_s1 = sld [smem:[#allocation13_spill]] }
  0x18   : > { %p685_p10 = pnand %p347_p9, %p657_p1 }
  0x1a   : > { %p434_p12 = pneg %p685_p10 }
  0x1d   : > { %s432_s30 = scalar_lea.hbm %s868_s1, 64 }
  0x1e   : > { %p433_p11 = scmp.ne.s32.totalorder %s868_s1, %s432_s30  ;;  %p439_p3 = scmp.lt.u32.totalorder %s432_s30, %s868_s1 }
  0x20   : > { %p435_p13 = pnand %p434_p12, %p433_p11 }
  0x22   : > { %p436_p0 = pneg %p435_p13 }
  0x24   : > { %p441_p5 = pnand %p439_p3, %p436_p0 }
  0x26   : > { %444 = shalt.err (!%p441_p5)
}
  0x27   : > { %s445_s7 = scalar_lea.vmem %s127_s25, 64  ;;  %p453_p1 = scmp.lt.s32.totalorder %s127_s25, %s127_s25 }
  0x28   : > { %p446_p7 = scmp.ne.s32.totalorder %s127_s25, %s445_s7  ;;  %p454_p4 = scmp.lt.s32.totalorder %s445_s7, %s445_s7 }
  0x2a   : > { %p448_p9 = pnand %p446_p7, %p434_p12  ;;  %p455_p8 = por %p454_p4, %p453_p1 }
  0x2c   : > { %p449_p6 = pneg %p448_p9 }
  0x2e   : > { %p456_p2 = pnand %p455_p8, %p449_p6 }
  0x30   : > { %459 = shalt.err (!%p456_p2)
}
  0x31   : > { %350 = dma.hbm_to_vmem [thread:$0]  (!%p685_p10), %s868_s1, 64, %s127_s25, [#allocation6]  }
  0x32   : > { %p29_p1 = scmp.ge.s32.totalorder %s28_s27, 2  ;;  %s31_s18 = sadd.s32 1, %s588_s15 }
  0x33   : > { %s40_s24 = sadd.s32 1, %s572_s11  ;;  %p47_p2 = scmp.ne.s32.totalorder %s572_s11, %s568_s10 }
  0x34   : > { %s888_s27 = smov (%p29_p1, %s28_s27), 0  ;;  %s890_s18 = smov (!%p29_p1, %s31_s18), %s588_s15 }
  0x35   : > { %869 = sst [smem:[#allocation12_spill]] %s888_s27  ;;  %s36_s26 = ssub.s32 %s584_s14, %s888_s27 }
  0x36   : > { %p48_p4 = scmp.eq.s32.totalorder %s592_s16, 0  ;;  %p33_p6 = scmp.ge.s32.totalorder %s890_s18, 2 }
  0x37   : > { %p870_p8 = scmp.ne.s32.totalorder %s862_s20, 0  ;;  %p360_p12 = scmp.lt.s32.totalorder %s592_s16, 4 }
  0x38   : > { %p722_p10 = por %p48_p4, %p47_p2  ;;  %s892_s18 = smov (%p33_p6, %s890_s18), 0 }
  0x39   : > { %p718_p11 = por %p870_p8, %p47_p2  ;;  %s137_s29 = sand.u32 1, %s572_s11  }
  0x3a   : > { %s328_s30 = sshll.u32 %s588_s15, 1  ;;  %s35_s3 = ssub.s32 %s588_s15, %s892_s18 }
  0x3b   : > { %s37_s4 = sor.u32 %s36_s26, %s35_s3  ;;  %s327_s5 = sshll.u32 %s137_s29, 2 }
  0x3c   : > { %p38_p13 = scmp.eq.s32.totalorder %s37_s4, 0  ;;  %s146_s20 = sadd.s32 %s584_s14, %s328_s30 }
  0x3d   : > { %s141_s6 = scalar_lea.vmem [#allocation2], %s327_s5  ;;  %s329_s17 = sshll.u32 %s146_s20, 6 }
  0x3e   : > { %s150_s7 = sshll.u32 %s141_s6, 4  ;;  %s742_s22 = scalar_lea.hbm %s851_s0, %s329_s17  ;;  %s737_s7 = int_to_ptr.vmem [resolvable:$true] %s150_s7 }
  0x3f   : > { %s735_s8 = scalar_select %p38_p13, %s572_s11, %s40_s24  }
  0x40   : > { %p748_p0 = pnand %p360_p12, %p722_p10  ;;  %s138_s24 = scalar_lea.sflag [#allocation3], %s137_s29 }
  0x41   : > { %s460_s30 = scalar_lea.hbm %s742_s22, 64  ;;  %s465_s25 = scalar_lea.hbm %s851_s0, 256 }
  0x42   : > { %p461_p3 = scmp.ne.s32.totalorder %s742_s22, %s460_s30  ;;  %p462_p5 = pneg %p748_p0 }
  0x43   : > { %p466_p1 = scmp.lt.u32.totalorder %s742_s22, %s851_s0  ;;  %p467_p2 = scmp.lt.u32.totalorder %s465_s25, %s460_s30 }
  0x44   : > { %p463_p7 = pnand %p462_p5, %p461_p3  ;;  %p469_p6 = scmp.lt.u32.totalorder %s460_s30, %s742_s22 }
  0x45   : > { %p468_p4 = por %p467_p2, %p466_p1 }
  0x46   : > { %p464_p9 = pneg %p463_p7 }
  0x47   : > { %p470_p8 = por %p469_p6, %p468_p4 }
  0x49   : > { %p471_p10 = pnand %p470_p8, %p464_p9 }
  0x4b   : > { %474 = shalt.err (!%p471_p10)
}
  0x4c   : > { %s475_s29 = scalar_lea.vmem %s737_s7, 64  ;;  %s595_s5 = smov [#allocation2]  }
  0x4d   : > { %p476_p12 = scmp.ne.s32.totalorder %s737_s7, %s475_s29  ;;  %s480_s20 = sshll.u32 %s595_s5, 4  ;;  %s481_s20 = int_to_ptr.vmem [resolvable:$false] %s480_s20 }
  0x4e   : > { %s482_s6 = scalar_lea.vmem %s481_s20, 128  ;;  %p483_p7 = scmp.lt.s32.totalorder %s737_s7, %s481_s20 }
  0x4f   : > { %p478_p13 = pnand %p476_p12, %p462_p5  ;;  %p484_p1 = scmp.lt.s32.totalorder %s482_s6, %s475_s29 }
  0x51   : > { %p479_p3 = pneg %p478_p13  ;;  %p485_p2 = por %p484_p1, %p483_p7 }
  0x53   : > { %p486_p4 = pnand %p485_p2, %p479_p3 }
  0x55   : > { %489 = shalt.err (!%p486_p4)
}
  0x56   : > { %354 = dma.hbm_to_vmem [thread:$0]  (!%p748_p0), %s742_s22, 64, %s737_s7, %s138_s24  }
  0x57   : > { %p874_p9 = scmp.ne.s32.totalorder %s866_s23, 0 }
  0x58   : > { %s780_s17 = sand.u32 (!%p874_p9), 1, %s568_s10   ;;  %p875_p5 = scmp.ne.s32.totalorder (!%p874_p9), %s863_s21, 0 }
  0x59   : > { %159 = sbr.rel (%p874_p9) target bundleno = 246 (0xf6), region = 28  ;;  %s331_s30 = sshll.u32 (!%p874_p9), %s780_s17, 2 }
  0x5a   : > { %s162_s1 = scalar_lea.sflag (!%p874_p9), [#allocation3], %s780_s17  ;;  %s165_s27 = scalar_lea.vmem (!%p874_p9), [#allocation2], %s331_s30 }
  0x60   : > { %551 = dma.done.wait (%p875_p5), %s162_s1, 64  }
  0x61   : > { %553 = vsyncadd (%p875_p5), %s162_s1, 4294967232  ;;  %p876_p6 = scmp.ne.s32.totalorder %s861_s19, 0 }
  0x63   : > { %555 = dma.done.wait (%p876_p6), [#allocation6], 64  }
  0x64   : > { %557 = vsyncadd (%p876_p6), [#allocation6], 4294967232  ;;  %v596_v0 = vmov 0   ;;  %v203_v1 = vld [vmem:[#allocation5] sm:$0xf]  ;;  %vm192_vm0 = vcmask 1043456  }
  0x65   : > { %429 = vset.pattern.permute.xlu0 %v596_v0  ;;  %v190_v2 = vld [vmem:[%s165_s27] sm:$0xf]  ;;  %s335_s19 = sshll.u32 %s580_s13, 1  ;;  %s189_s23 = scalar_lea.vmem [#allocation7], %s331_s30 }
  0x66   : > { %206 = vperm.xlu0 %429, %v203_v1   ;;  %v191_v3 = vmul.f32 %v190_v2, %v190_v2  ;;  %s223_s21 = sadd.s32 %s576_s12, %s335_s19  ;;  %s227_s7 = sshll.u32 %s189_s23, 4  ;;  %s799_s7 = int_to_ptr.vmem [resolvable:$true] %s227_s7 }
  0x67   : > { %s336_s22 = sshll.u32 %s223_s21, 6  ;;  %s212_s13 = scalar_lea.sflag [#allocation4], %s780_s17 }
  0x68   : > { %v193_v4 = vsel %vm192_vm0, %v191_v3, 0.0  ;;  %s797_s25 = scalar_lea.hbm %s853_s2, %s336_s22  ;;  %s490_s3 = scalar_lea.vmem %s799_s7, 64 }
  0x69   : > { %v194_v5 = vrot.slane %v193_v4, 4  ;;  %p491_p0 = scmp.ne.s32.totalorder %s799_s7, %s490_s3  ;;  %s597_s12 = smov [#allocation7]  }
  0x6a   : > { %s494_s4 = sshll.u32 %s597_s12, 4  ;;  %s495_s4 = int_to_ptr.vmem [resolvable:$false] %s494_s4 }
  0x6b   : > { %v195_v6 = vadd.f32 %v194_v5, %v193_v4  ;;  %p492_p8 = pnand %p491_p0, %p718_p11  ;;  %s496_s29 = scalar_lea.vmem %s495_s4, 128 }
  0x6c   : > { %p497_p12 = scmp.lt.s32.totalorder %s799_s7, %s495_s4  ;;  %p498_p13 = scmp.lt.s32.totalorder %s496_s29, %s490_s3 }
  0x6d   : > { %v196_v7 = vrot.slane %v195_v6, 2  ;;  %p493_p10 = pneg %p492_p8 }
  0x6e   : > { %p499_p3 = por %p498_p13, %p497_p12 }
  0x6f   : > { %v197_v8 = vadd.f32 %v196_v7, %v195_v6 }
  0x70   : > { %p500_p7 = pnand %p499_p3, %p493_p10 }
  0x71   : > { %v198_v9 = vrot.slane %v197_v8, 1 }
  0x73   : > { %v199_v10 = vadd.f32 %v198_v9, %v197_v8 }
  0x75   : > { %v200_v11 = vmax.f32 %v199_v10, 1e-24 }
  0x77   : > { %430 = vrsqrt.f32 %v200_v11 }
  0x81   : > { %v431_v12 = vpop.eup %430 }
  0x82   : > { %v202_v13 = vmul.f32 %v431_v12, %v190_v2 }
  0xe5   : > { %v207_v14 = vpop.permute.xlu0 %206 }
  0xe6   : > { %v209_v15 = vmul.f32 %v207_v14, %v202_v13 }
  0xe8   : > { %210 = vst [vmem:[%s189_s23] sm:$0xf] %v209_v15 }
  0xe9   : > { %503 = shalt.err (!%p500_p7)
}
  0xea   : > { %s504_s5 = scalar_lea.hbm %s797_s25, 64  ;;  %s508_s17 = scalar_lea.hbm %s853_s2, 256 }
  0xeb   : > { %p505_p1 = scmp.ne.s32.totalorder %s797_s25, %s504_s5  ;;  %p509_p9 = scmp.lt.u32.totalorder %s797_s25, %s853_s2 }
  0xec   : > { %p510_p5 = scmp.lt.u32.totalorder %s508_s17, %s504_s5  ;;  %p512_p0 = scmp.lt.u32.totalorder %s504_s5, %s797_s25 }
  0xed   : > { %p506_p2 = pnand %p505_p1, %p718_p11 }
  0xee   : > { %p511_p6 = por %p510_p5, %p509_p9 }
  0xef   : > { %p507_p4 = pneg %p506_p2 }
  0xf0   : > { %p513_p8 = por %p512_p0, %p511_p6 }
  0xf2   : > { %p514_p10 = pnand %p513_p8, %p507_p4 }
  0xf4   : > { %517 = shalt.err (!%p514_p10)
}
  0xf5   : > { %345 = dma.vmem_to_hbm [thread:$0]  (%p718_p11), %s799_s7, 64, %s797_s25, %s212_s13  }
  0xf6 PF: > { %s877_s27 = sld [smem:[#allocation11_spill]]  ;;  %p362_p12 = scmp.ge.s32.totalorder %s592_s16, 2 }
  0xf7   : > { %s239_s19 = sand.u32 1, %s564_s9  }
  0xf8   : > { %s240_s21 = scalar_lea.sflag [#allocation4], %s239_s19 }
  0xfc   : > { %p878_p13 = scmp.ne.s32.totalorder %s877_s27, 0 }
  0xfe   : > { %p356_p3 = pnand %p362_p12, %p878_p13 }
 0x100   : > { %559 = dma.done.wait (!%p356_p3), %s240_s21, 64  }
 0x101   : > { %561 = vsyncadd (!%p356_p3), %s240_s21, 4294967232  ;;  %s19_s16 = sadd.s32 1, %s592_s16   ;;  %s879_s28 = sld [smem:[#allocation12_spill]] }
 0x102   : > { %p16_p7 = scmp.ge.s32.totalorder %s19_s16, 6   ;;  %s880_s9 = smov %s568_s10 }
 0x103   : > { %s881_s10 = smov %s572_s11  ;;  %s882_s11 = smov %s735_s8 }
 0x104   : > { %s883_s12 = smov %s584_s14  ;;  %s884_s13 = smov %s588_s15 }
 0x105   : > { %s886_s15 = smov %s892_s18  ;;  %18 = sbr.rel (!%p16_p7) target bundleno = 10 (0xa), region = 77 }
 0x107   : > { %s885_s14 = smov %s879_s28 }
 0x10c   :  { %245 = vsyncpa [#allocation3], 1 }
 0x10d   :  { %247 = vsyncpa [#allocation3 + $0x1], 1 }
 0x10e   :  { %248 = vsyncpa [#allocation6], 1 }
 0x10f   :  { %249 = vsyncpa [#allocation4], 1 }
 0x110   :  { %251 = vsyncpa [#allocation4 + $0x1], 1 }

</bundles_post_ra>
